<compile_context>
chip_gen: v6e
topology: v6e:2x2x1
jax: 0.10.0
libtpu: 0.0.40
codegen_flags: <defaults>
</compile_context>

<pallas_src>
import functools

import jax
import jax.numpy as jnp
from jax.experimental import pallas as pl
from jax.experimental.pallas import tpu as pltpu


def cnn_kernel(x_ref, w_ref, b_ref, out_ref, *, kernel_size, padding):
    # x_ref:   (TILE_B, m_word, e_char)        channel-last input block
    # w_ref:   (kernel_size * e_char, e_word_pad)  im2col-flattened weight
    # b_ref:   (1, e_word_pad)
    # out_ref: (TILE_B, e_word_pad)
    x = x_ref[...]
    tb, m_word, e_char = x.shape
    l_out = m_word + 2 * padding - kernel_size + 1

    # Zero-pad the time axis in-register (avoids a wrapper-side HBM round trip).
    zpad = jnp.zeros((tb, padding, e_char), x.dtype)
    xp = jnp.concatenate([zpad, x, zpad], axis=1)          # (TB, m_pad, e_char)

    # im2col: k shifted windows concatenated on the channel axis -> single
    # (TB*l_out, k*e_char) @ (k*e_char, e_word_pad) MXU matmul.
    windows = [xp[:, j:j + l_out, :] for j in range(kernel_size)]
    xw = jnp.concatenate(windows, axis=2)                  # (TB, l_out, k*e_char)

    acc = jax.lax.dot_general(
        xw, w_ref[...],
        dimension_numbers=(((2,), (0,)), ((), ())),
        preferred_element_type=jnp.float32)                # (TB, l_out, e_word_pad)

    acc = acc + b_ref[...].astype(jnp.float32)             # bias (broadcast)
    acc = jnp.maximum(acc, 0.0)                            # ReLU
    out_ref[...] = jnp.max(acc, axis=1).astype(out_ref.dtype)   # max over time


def _pick_tile_b(batch, m_word, e_char, e_word_pad, kernel_size, padding, itemsize,
                 budget_bytes=12 * 1024 * 1024):
    """Largest batch tile (multiple of 8, capped) whose working set fits a
    conservative VMEM budget (safe under the v5e 16 MiB / v7x 32 MiB scoped
    defaults; v7x has only 64 MiB physical per core so we stay well inside)."""
    m_pad = m_word + 2 * padding
    l_out = m_pad - kernel_size + 1

    def footprint(tb):
        x_blk = 2 * tb * m_word * e_char * itemsize          # double-buffered in
        out_blk = 2 * tb * e_word_pad * itemsize             # double-buffered out
        im2col = tb * l_out * kernel_size * e_char * 4       # in-register windows
        acc = tb * l_out * e_word_pad * 4                    # f32 accumulator
        return x_blk + out_blk + im2col + acc

    if batch <= 8:
        return batch
    tb = 8
    while tb * 2 <= min(batch, 512) and footprint(tb * 2) <= budget_bytes:
        tb *= 2
    return tb


def cnn_forward(x, weight, bias, *, kernel_size=5, padding=1):
    """x: (B, e_char, m_word); weight: (e_word, e_char, k); bias: (e_word,)."""
    batch, e_char, m_word = x.shape
    e_word = weight.shape[0]
    l_out = m_word + 2 * padding - kernel_size + 1
    assert l_out >= 1

    # Lane-dense output width (multiple of 128); pad is sliced off at the end.
    e_word_pad = ((e_word + 127) // 128) * 128

    # Channel-last input so each im2col window is a natural MXU lhs.
    x_k = jnp.transpose(x, (0, 2, 1))                        # (B, m_word, e_char)
    # im2col-flattened weight: row (j * e_char + c) <-> weight[:, c, j].
    w_k = jnp.transpose(weight, (2, 1, 0)).reshape(kernel_size * e_char, e_word)
    w_k = jnp.pad(w_k, ((0, 0), (0, e_word_pad - e_word))).astype(x.dtype)
    b_k = jnp.pad(bias, (0, e_word_pad - e_word)).reshape(1, e_word_pad)
    b_k = b_k.astype(jnp.float32)

    itemsize = jnp.dtype(x.dtype).itemsize
    tile_b = _pick_tile_b(batch, m_word, e_char, e_word_pad, kernel_size, padding,
                          itemsize)
    grid = (pl.cdiv(batch, tile_b),)

    kernel = functools.partial(cnn_kernel, kernel_size=kernel_size, padding=padding)

    cost = pl.CostEstimate(
        flops=2 * batch * l_out * kernel_size * e_char * e_word,
        transcendentals=0,
        bytes_accessed=(x.size * itemsize
                        + w_k.size * jnp.dtype(w_k.dtype).itemsize
                        + b_k.size * 4
                        + batch * e_word_pad * itemsize))

    out = pl.pallas_call(
        kernel,
        out_shape=jax.ShapeDtypeStruct((batch, e_word_pad), x.dtype),
        grid=grid,
        in_specs=[
            pl.BlockSpec((tile_b, m_word, e_char), lambda i: (i, 0, 0)),
            pl.BlockSpec((kernel_size * e_char, e_word_pad), lambda i: (0, 0)),
            pl.BlockSpec((1, e_word_pad), lambda i: (0, 0)),
        ],
        out_specs=pl.BlockSpec((tile_b, e_word_pad), lambda i: (i, 0)),
        compiler_params=pltpu.CompilerParams(
            dimension_semantics=("parallel",)),
        cost_estimate=cost,
    )(x_k, w_k, b_k)

    # TODO(synk): the remaining wrapper-side transpose of x could be folded
    # into the kernel (in-kernel swapaxes) to save one more HBM round trip.
    return out[:, :e_word]


def cnn_reference(x, weight, bias, *, padding=1):
    """Pure-JAX reference mirroring nn.Conv1d + ReLU + max(dim=2)."""
    conv = jax.lax.conv_general_dilated(
        x, weight, window_strides=(1,), padding=[(padding, padding)],
        dimension_numbers=("NCH", "OIH", "NCH"))
    conv = conv + bias[None, :, None]
    return jnp.max(jax.nn.relu(conv), axis=2)


if __name__ == "__main__":
    batch, e_char, m_word = 2, 8, 16
    e_word, kernel_size, padding = 32, 5, 1

    key = jax.random.PRNGKey(0)
    kx, kw, kb = jax.random.split(key, 3)
    x = jax.random.normal(kx, (batch, e_char, m_word), dtype=jnp.float32)
    # Deterministic synthetic Conv1d parameters (PyTorch-style uniform bound).
    bound = 1.0 / (e_char * kernel_size) ** 0.5
    weight = jax.random.uniform(kw, (e_word, e_char, kernel_size),
                                minval=-bound, maxval=bound, dtype=jnp.float32)
    bias = jax.random.uniform(kb, (e_word,), minval=-bound, maxval=bound,
                              dtype=jnp.float32)

    out = cnn_forward(x, weight, bias, kernel_size=kernel_size, padding=padding)
    out = jax.block_until_ready(out)

    ref = cnn_reference(x, weight, bias, padding=padding)
    assert out.shape == (batch, e_word), out.shape
    assert jnp.allclose(out, ref, atol=1e-5, rtol=1e-5), \
        float(jnp.max(jnp.abs(out - ref)))
    print("KERNEL_OK")
</pallas_src>

<mosaic_0001>
module attributes {stable_mosaic.version = 11 : i64} {
  func.func @cnn_kernel(%arg0: i32, %arg1: memref<2x16x8xf32, #tpu.memory_space<vmem>>, %arg2: memref<40x128xf32, #tpu.memory_space<vmem>>, %arg3: memref<1x128xf32, #tpu.memory_space<vmem>>, %arg4: memref<2x128xf32, #tpu.memory_space<vmem>>) attributes {dimension_semantics = [#tpu.dimension_semantics<parallel>], iteration_bounds = array<i64: 1>, scalar_prefetch = 0 : i64, scratch_operands = 0 : i64, tpu.core_type = #tpu.core_type<tc>, window_params = [{transform_indices = @transform_0, window_bounds = array<i64: 2, 16, 8>}, {pipeline_mode = #tpu.pipeline_mode<synchronous>, transform_indices = @transform_1, window_bounds = array<i64: 40, 128>}, {pipeline_mode = #tpu.pipeline_mode<synchronous>, transform_indices = @transform_2, window_bounds = array<i64: 1, 128>}, {transform_indices = @transform_3, window_bounds = array<i64: 2, 128>}]} {
    %c0 = arith.constant 0 : index
    %c0_0 = arith.constant 0 : index
    %c0_1 = arith.constant 0 : index
    %0 = vector.load %arg1[%c0, %c0_0, %c0_1] : memref<2x16x8xf32, #tpu.memory_space<vmem>>, vector<2x16x8xf32>
    %cst = arith.constant 0.000000e+00 : f32
    %1 = vector.broadcast %cst : f32 to vector<2x1x8xf32>
    %2 = tpu.concatenate %1, %0, %1 in 1 : vector<2x1x8xf32>, vector<2x16x8xf32>, vector<2x1x8xf32> -> vector<2x18x8xf32>
    %3 = vector.extract_strided_slice %2 {offsets = [0, 0, 0], sizes = [2, 14, 8], strides = [1, 1, 1]} : vector<2x18x8xf32> to vector<2x14x8xf32>
    %4 = vector.extract_strided_slice %2 {offsets = [0, 1, 0], sizes = [2, 14, 8], strides = [1, 1, 1]} : vector<2x18x8xf32> to vector<2x14x8xf32>
    %5 = vector.extract_strided_slice %2 {offsets = [0, 2, 0], sizes = [2, 14, 8], strides = [1, 1, 1]} : vector<2x18x8xf32> to vector<2x14x8xf32>
    %6 = vector.extract_strided_slice %2 {offsets = [0, 3, 0], sizes = [2, 14, 8], strides = [1, 1, 1]} : vector<2x18x8xf32> to vector<2x14x8xf32>
    %7 = vector.extract_strided_slice %2 {offsets = [0, 4, 0], sizes = [2, 14, 8], strides = [1, 1, 1]} : vector<2x18x8xf32> to vector<2x14x8xf32>
    %8 = tpu.concatenate %3, %4, %5, %6, %7 in 2 : vector<2x14x8xf32>, vector<2x14x8xf32>, vector<2x14x8xf32>, vector<2x14x8xf32>, vector<2x14x8xf32> -> vector<2x14x40xf32>
    %c0_2 = arith.constant 0 : index
    %c0_3 = arith.constant 0 : index
    %9 = vector.load %arg2[%c0_2, %c0_3] : memref<40x128xf32, #tpu.memory_space<vmem>>, vector<40x128xf32>
    %cst_4 = arith.constant dense<0.000000e+00> : vector<2x14x128xf32>
    %10 = tpu.matmul %8, %9, %cst_4 {dimension_numbers = #tpu.dot_dimension_numbers<[2], [0], [0, 1], [1], [0, 0, 0, 1, 1, 1], [], []>} : vector<2x14x40xf32>, vector<40x128xf32>, vector<2x14x128xf32> -> vector<2x14x128xf32>
    %c0_5 = arith.constant 0 : index
    %c0_6 = arith.constant 0 : index
    %11 = vector.load %arg3[%c0_5, %c0_6] : memref<1x128xf32, #tpu.memory_space<vmem>>, vector<1x128xf32>
    %12 = vector.shape_cast %11 : vector<1x128xf32> to vector<1x1x128xf32>
    %13 = vector.broadcast %12 : vector<1x1x128xf32> to vector<2x14x128xf32>
    %14 = arith.addf %10, %13 : vector<2x14x128xf32>
    %cst_7 = arith.constant 0.000000e+00 : f32
    %15 = vector.broadcast %cst_7 : f32 to vector<2x14x128xf32>
    %16 = arith.maximumf %14, %15 : vector<2x14x128xf32>
    %cst_8 = arith.constant dense<0xFF800000> : vector<2x128xf32>
    %17 = vector.multi_reduction <maximumf>, %16, %cst_8 [1] : vector<2x14x128xf32> to vector<2x128xf32>
    %c0_9 = arith.constant 0 : index
    %c0_10 = arith.constant 0 : index
    %18 = vector.load %arg4[%c0_9, %c0_10] : memref<2x128xf32, #tpu.memory_space<vmem>>, vector<2x128xf32>
    tpu.vector_store %arg4[%c0_9, %c0_10], %17 {strides = array<i32>} : memref<2x128xf32, #tpu.memory_space<vmem>>, vector<2x128xf32>,
    return
  }
  func.func @transform_0(%arg0: i32) -> (i32, i32, i32) {
    %c0_i32 = arith.constant 0 : i32
    %c0_i32_0 = arith.constant 0 : i32
    %c0_i32_1 = arith.constant 0 : i32
    return %arg0, %c0_i32, %c0_i32_0 : i32, i32, i32
  }
  func.func @transform_1(%arg0: i32) -> (i32, i32) {
    %c0_i32 = arith.constant 0 : i32
    %c0_i32_0 = arith.constant 0 : i32
    %c0_i32_1 = arith.constant 0 : i32
    return %c0_i32, %c0_i32_0 : i32, i32
  }
  func.func @transform_2(%arg0: i32) -> (i32, i32) {
    %c0_i32 = arith.constant 0 : i32
    %c0_i32_0 = arith.constant 0 : i32
    %c0_i32_1 = arith.constant 0 : i32
    return %c0_i32, %c0_i32_0 : i32, i32
  }
  func.func @transform_3(%arg0: i32) -> (i32, i32) {
    %c0_i32 = arith.constant 0 : i32
    %c0_i32_0 = arith.constant 0 : i32
    return %arg0, %c0_i32 : i32, i32
  }
}

</mosaic_0001>

<bundles_post_ra>
// kernel: tpu_custom_call.1
= control target key start
LH: loop header
LB: loop body
LE: loop exit
PB: predicated region body
PF: predicated region fallthrough
CT: control target
= control target key end

     0   :  { %vm23_vm0 = vcmask 1040384   ;;  %vm61_vm1 = vcmask 1045504   ;;  %vm42_vm2 = vcmask 1046528   ;;  %s907_s0 = inlined_call_operand.vmem [shape: f32[2,16,8], index: 0, kind: input, shape index: {}]   ;;  %s908_s1 = inlined_call_operand.vmem [shape: f32[40,128], index: 1, kind: input, shape index: {}]   ;;  %s909_s2 = inlined_call_operand.vmem [shape: f32[1,128], index: 2, kind: input, shape index: {}]   ;;  %s910_s3 = inlined_call_operand.hbm [shape: f32[2,128], index: 3, kind: output, shape index: {}]  }
   0x1   :  { %v17_v0 = vld [vmem:[%s907_s0 + $0x10] sm:$0xff]  ;;  %v18_v1 = vld [vmem:[%s907_s0 + $0x18] sm:$0xff]  ;;  %v15_v4 = vld [vmem:[%s907_s0] sm:$0xff] }
   0x2   :  { %v27_v2 = vrot.slane %v17_v0, 7  ;;  %v28_v3 = vrot.slane %v18_v1, 7  ;;  %v16_v5 = vld [vmem:[%s907_s0 + $0x8] sm:$0xff]  ;;  %v24_v6 = vrot.slane %v15_v4, 7 }
   0x3   :  { %v25_v7 = vrot.slane %v16_v5, 7 }
   0x4   :  { %v764_v8 = vsel %vm23_vm0, %v27_v2, %v28_v3  ;;  %v767_v9 = vsel %vm23_vm0, 0.0, %v27_v2 }
   0x5   :  { %8 = vsyncpa [#allocation3], 0  ;;  %v65_v10 = vrot.slane %v767_v9, 2  ;;  %v66_v11 = vrot.slane %v764_v8, 2  ;;  %v46_v12 = vrot.slane %v767_v9, 1  ;;  %v47_v13 = vrot.slane %v764_v8, 1 }
   0x6   :  { %v774_v14 = vsel %vm23_vm0, %v24_v6, %v25_v7  ;;  %v777_v15 = vsel %vm23_vm0, 0.0, %v24_v6  ;;  %s725_s0 = smov 16   ;;  %s726_s20 = smov 8   ;;  %v88_v22 = vrot.slane %v767_v9, 3  ;;  %v89_v26 = vrot.slane %v764_v8, 3  ;;  %v152_v38 = vld [vmem:[%s908_s1 + $0x20] sm:$0xff] }
   0x7   :  { %v67_v16 = vsel %vm61_vm1, %v65_v10, %v66_v11  ;;  %v48_v17 = vsel %vm42_vm2, %v46_v12, %v47_v13  ;;  %v62_v18 = vrot.slane %v777_v15, 2  ;;  %v63_v19 = vrot.slane %v774_v14, 2  ;;  %s727_s21 = smov 24   ;;  %s728_s22 = smov 32   ;;  %687 = vmatprep.subr.mxu1 %v152_v38  ;;  %671 = vmatprep.subr.mxu0 %v152_v38  ;;  %v151_v41 = vld [vmem:[%s908_s1 + $0x18] sm:$0xff]  ;;  %v150_v42 = vld [vmem:[%s908_s1 + $0x10] sm:$0xff] }
   0x8   :  { %72 = vrot.lane.b32.xlu1 %v67_v16, %s725_s0  ;;  %53 = vrot.lane.b32.xlu0 %v48_v17, %s726_s20  ;;  %v43_v20 = vrot.slane %v777_v15, 1  ;;  %v44_v21 = vrot.slane %v774_v14, 1  ;;  %v83_v24 = vrot.slane %v777_v15, 3  ;;  %v84_v25 = vrot.slane %v774_v14, 3  ;;  %v149_v47 = vld [vmem:[%s908_s1 + $0x8] sm:$0xff]  ;;  %v148_v48 = vld [vmem:[%s908_s1] sm:$0xff] }
   0x9   :  { %v64_v23 = vsel %vm61_vm1, %v62_v18, %v63_v19  ;;  %vm82_vm3 = vcmask 1044480   ;;  %v111_v30 = vrot.slane %v767_v9, 4  ;;  %v112_v31 = vrot.slane %v764_v8, 4  ;;  %692 = vmatpush3.msra.mxu1 %v152_v38  ;;  %672 = vmatpush3.msra.mxu0 %v152_v38 }
   0xa   :  { %v45_v27 = vsel %vm42_vm2, %v43_v20, %v44_v21  ;;  %v85_v28 = vsel %vm82_vm3, %v83_v24, %v84_v25  ;;  %v90_v29 = vsel %vm82_vm3, %v88_v22, %v89_v26  ;;  %vm105_vm4 = vcmask 1043456   ;;  %688 = vmatprep.subr.mxu1 %v151_v41  ;;  %673 = vmatprep.subr.mxu0 %v151_v41 }
   0xb   :  { %v113_v32 = vsel %vm105_vm4, %v111_v30, %v112_v31  ;;  %v106_v33 = vrot.slane %v777_v15, 4  ;;  %v107_v34 = vrot.slane %v774_v14, 4  ;;  %v39_v36 = vsel %vm23_vm0, %v28_v3, 0.0  ;;  %693 = vmatpush3.msra.mxu1 %v151_v41  ;;  %674 = vmatpush3.msra.mxu0 %v151_v41 }
   0xc   :  { %68 = vrot.lane.b32.xlu1 %v64_v23, %s725_s0  ;;  %49 = vrot.lane.b32.xlu0 %v45_v27, %s726_s20  ;;  %v38_v37 = vsel %vm23_vm0, %v25_v7, 0.0  ;;  %v91_v39 = vrot.slane %v39_v36, 3  ;;  %v114_v45 = vrot.slane %v39_v36, 4  ;;  %v729_v57 = vmov 1983009808  }
   0xd   :  { %v108_v35 = vsel %vm105_vm4, %v106_v33, %v107_v34  ;;  %v86_v40 = vrot.slane %v38_v37, 3  ;;  %v109_v46 = vrot.slane %v38_v37, 4  ;;  %689 = vmatprep.subr.mxu1 %v150_v42  ;;  %675 = vmatprep.subr.mxu0 %v150_v42  ;;  %v165_v58 = vunpack.c.l.s4 %v729_v57 }
   0xe   :  { %v92_v43 = vsel %vm82_vm3, %v89_v26, %v91_v39  ;;  %694 = vmatpush3.msra.mxu1 %v150_v42  ;;  %676 = vmatpush3.msra.mxu0 %v150_v42  ;;  %v115_v49 = vsel %vm105_vm4, %v112_v31, %v114_v45  ;;  %v167_v59 = vlaneseq  ;;  %vm128_vm5 = vcmask 64512  }
   0xf   :  { %v87_v44 = vsel %vm82_vm3, %v84_v25, %v86_v40  ;;  %v110_v50 = vsel %vm105_vm4, %v107_v34, %v109_v46  ;;  %690 = vmatprep.subr.mxu1 %v149_v47  ;;  %677 = vmatprep.subr.mxu0 %v149_v47  ;;  %v166_v62 = vunpack.c.0.s8 %v165_v58  ;;  %vm133_vm6 = vcmask 130048  }
  0x10   :  { %93 = vrot.lane.b32.xlu1 %v85_v28, %s727_s21  ;;  %97 = vrot.lane.b32.xlu0 %v90_v29, %s727_s21  ;;  %v168_v63 = vshrl.u32 %v167_v59, 7  ;;  %vm138_vm7 = vcmask 195584   ;;  %vm143_vm8 = vcmask 261120   ;;  %vm352_vm9 = vcmask 326656  }
  0x11   :  { %695 = vmatpush3.msra.mxu1 %v149_v47  ;;  %678 = vmatpush3.msra.mxu0 %v149_v47  ;;  %vm639_vm10 = vcmask 1041409  }
  0x12   :  { %691 = vmatprep.subr.mxu1 %v148_v48  ;;  %679 = vmatprep.subr.mxu0 %v148_v48  ;;  %v843_v5 = vsub.s32 %v166_v62, %v168_v63 }
  0x13   :  { %696 = vmatpush3.msra.mxu1 %v148_v48  ;;  %680 = vmatpush3.msra.mxu0 %v148_v48 }
  0x14   :  { %51 = vrot.lane.b32.xlu1 %v44_v21, %s726_s20  ;;  %120 = vrot.lane.b32.xlu0 %v113_v32, %s728_s22 }
  0x18   :  { %116 = vrot.lane.b32.xlu1 %v108_v35, %s728_s22  ;;  %55 = vrot.lane.b32.xlu0 %v47_v13, %s726_s20 }
  0x1c   :  { %74 = vrot.lane.b32.xlu1 %v66_v11, %s725_s0  ;;  %70 = vrot.lane.b32.xlu0 %v63_v19, %s725_s0 }
  0x20   :  { %99 = vrot.lane.b32.xlu1 %v92_v43, %s727_s21  ;;  %95 = vrot.lane.b32.xlu0 %v87_v44, %s727_s21 }
  0x24   :  { %122 = vrot.lane.b32.xlu1 %v115_v49, %s728_s22  ;;  %118 = vrot.lane.b32.xlu0 %v110_v50, %s728_s22 }
  0x7a   :  { %v73_v51 = vpop.permute.xlu1 %72  ;;  %v54_v52 = vpop.permute.xlu0 %53 }
  0x7b   :  { %v131_v1 = vsel %vm128_vm5, %v767_v9, %v54_v52 }
  0x7c   :  { %v136_v4 = vsel %vm133_vm6, %v131_v1, %v73_v51 }
  0x7e   :  { %v69_v53 = vpop.permute.xlu1 %68  ;;  %v50_v54 = vpop.permute.xlu0 %49 }
  0x7f   :  { %v129_v60 = vsel %vm128_vm5, %v777_v15, %v50_v54 }
  0x80   :  { %v134_v2 = vsel %vm133_vm6, %v129_v60, %v69_v53  ;;  %v657_v60 = vld [vmem:[%s909_s2] ss:$0 sm:$0xff]  ;;  %s730_s2 = smov [#allocation2]  }
  0x81   :  { %v236_v62 = vrot.slane %v657_v60, %v843_v5  ;;  %s649_s7 = sshll.u32 %s730_s2, 4  ;;  %s650_s7 = int_to_ptr.vmem [resolvable:$true] %s649_s7 }
  0x82   :  { %v94_v55 = vpop.permute.xlu1 %93  ;;  %v98_v56 = vpop.permute.xlu0 %97  ;;  %s703_s8 = scalar_lea.vmem %s650_s7, 32  ;;  %p708_p1 = scmp.lt.s32.totalorder %s650_s7, %s650_s7 }
  0x83   :  { %v139_v3 = vsel %vm138_vm7, %v134_v2, %v94_v55  ;;  %v141_v10 = vsel %vm138_vm7, %v136_v4, %v98_v56  ;;  %p704_p0 = scmp.ne.s32.totalorder %s650_s7, %s703_s8  ;;  %p709_p2 = scmp.lt.s32.totalorder %s703_s8, %s703_s8 }
  0x85   :  { %p710_p3 = por %p709_p2, %p708_p1 }
  0x86   :  { %v52_v61 = vpop.permute.xlu1 %51  ;;  %v121_v0 = vpop.permute.xlu0 %120 }
  0x87   :  { %v146_v12 = vsel %vm143_vm8, %v141_v10, %v121_v0  ;;  %v130_v28 = vsel %vm128_vm5, %v774_v14, %v52_v61  ;;  %v229_v61 = vcombine.high %v657_v60, %v657_v60  ;;  %v244_v0 = vcombine.high %v236_v62, %v236_v62  ;;  %p711_p4 = pnand %p710_p3, %p704_p0 }
  0x88   :  { %v196_v19 = vcombine.high %v146_v12, %v146_v12  ;;  %v203_v20 = vrot.slane %v146_v12, %v843_v5 }
  0x89   :  { %v243_v63 = vrot.slane %v229_v61, %v843_v5 }
  0x8a   :  { %v117_v6 = vpop.permute.xlu1 %116  ;;  %v56_v7 = vpop.permute.xlu0 %55  ;;  %v210_v26 = vrot.slane %v196_v19, %v843_v5  ;;  %v211_v27 = vcombine.high %v203_v20, %v203_v20 }
  0x8b   :  { %v144_v11 = vsel %vm143_vm8, %v139_v3, %v117_v6  ;;  %v132_v29 = vsel %vm128_vm5, %v764_v8, %v56_v7  ;;  %v245_v1 = vcombine.high %v243_v63, %v243_v63  ;;  %v331_v2 = vcombine.low %v244_v0, %v243_v63 }
  0x8c   :  { %v163_v9 = vcombine.high %v144_v11, %v144_v11  ;;  %v170_v13 = vrot.slane %v144_v11, %v843_v5  ;;  %v212_v39 = vcombine.high %v210_v26, %v210_v26  ;;  %v280_v40 = vcombine.low %v211_v27, %v210_v26 }
  0x8d   :  { %v305_v3 = vcombine.low %v236_v62, %v244_v0  ;;  %v322_v4 = vcombine.low %v243_v63, %v236_v62  ;;  %v332_v6 = vcombine.low %v245_v1, %v236_v62  ;;  %v306_v7 = vcombine.low %v243_v63, %v245_v1 }
  0x8e   :  { %v177_v15 = vrot.slane %v163_v9, %v843_v5  ;;  %v178_v16 = vcombine.high %v170_v13, %v170_v13  ;;  %v75_v17 = vpop.permute.xlu1 %74  ;;  %v71_v18 = vpop.permute.xlu0 %70  ;;  %v288_v52 = vrot.slane %v280_v40, %v843_v5  ;;  %v339_v10 = vrot.slane %v331_v2, %v843_v5 }
  0x8f   :  { %v137_v32 = vsel %vm133_vm6, %v132_v29, %v75_v17  ;;  %v135_v33 = vsel %vm133_vm6, %v130_v28, %v71_v18  ;;  %v313_v11 = vrot.slane %v305_v3, %v843_v5  ;;  %v329_v12 = vrot.slane %v322_v4, %v843_v5 }
  0x90   :  { %v179_v21 = vcombine.high %v177_v15, %v177_v15  ;;  %v246_v22 = vcombine.low %v170_v13, %v178_v16  ;;  %v346_v9 = vrot.slane %v332_v6, %v843_v5  ;;  %v320_v13 = vrot.slane %v306_v7, %v843_v5 }
  0x92   :  { %v100_v23 = vpop.permute.xlu1 %99  ;;  %v96_v24 = vpop.permute.xlu0 %95  ;;  %v247_v25 = vcombine.low %v177_v15, %v179_v21  ;;  %v254_v30 = vrot.slane %v246_v22, %v843_v5  ;;  %v330_v15 = vcombine.low %v313_v11, %v329_v12  ;;  %v347_v16 = vcombine.low %v339_v10, %v346_v9 }
  0x93   :  { %v142_v34 = vsel %vm138_vm7, %v137_v32, %v100_v23  ;;  %v140_v35 = vsel %vm138_vm7, %v135_v33, %v96_v24  ;;  %v321_v21 = vcombine.low %v313_v11, %v320_v13 }
  0x94   :  { %v261_v31 = vrot.slane %v247_v25, %v843_v5 }
  0x96   :  { %v123_v36 = vpop.permute.xlu1 %122  ;;  %v119_v37 = vpop.permute.xlu0 %118  ;;  %v262_v38 = vcombine.low %v254_v30, %v261_v31 }
  0x97   :  { %v147_v14 = vsel %vm143_vm8, %v142_v34, %v123_v36  ;;  %v145_v8 = vsel %vm143_vm8, %v140_v35, %v119_v37 }
  0x98   :  { %v213_v41 = vcombine.high %v147_v14, %v147_v14  ;;  %v220_v42 = vrot.slane %v147_v14, %v843_v5  ;;  %v180_v43 = vcombine.high %v145_v8, %v145_v8  ;;  %v187_v44 = vrot.slane %v145_v8, %v843_v5  ;;  %681 = vmatprep.mubr.msk.f32.mxu0 %vm352_vm9, %v262_v38 }
  0x9a   :  { %v227_v45 = vrot.slane %v213_v41, %v843_v5  ;;  %v228_v46 = vcombine.high %v220_v42, %v220_v42  ;;  %v281_v47 = vcombine.low %v212_v39, %v220_v42  ;;  %v194_v48 = vrot.slane %v180_v43, %v843_v5 }
  0x9b   :  { %v195_v49 = vcombine.high %v187_v44, %v187_v44 }
  0x9c   :  { %v297_v50 = vcombine.low %v228_v46, %v227_v45  ;;  %v264_v51 = vcombine.low %v194_v48, %v203_v20  ;;  %v295_v53 = vrot.slane %v281_v47, %v843_v5 }
  0x9d   :  { %v263_v54 = vcombine.low %v187_v44, %v195_v49 }
  0x9e   :  { %v278_v55 = vrot.slane %v264_v51, %v843_v5  ;;  %v296_v56 = vcombine.low %v288_v52, %v295_v53  ;;  %v304_v57 = vrot.slane %v297_v50, %v843_v5 }
  0x9f   :  { %v271_v58 = vrot.slane %v263_v54, %v843_v5 }
  0xa0   :  { %684 = vmatprep.mubr.msk.f32.mxu1 %vm352_vm9, %v296_v56 }
  0xa1   :  { %685 = vmatmul.mubr.msk.f32.vlgmr.msra.gmra.mxu1 %vm352_vm9, %v304_v57  ;;  %v279_v59 = vcombine.low %v271_v58, %v278_v55 }
  0xa3   :  { %682 = vmatmul.mubr.msk.f32.vlgmr.msra.gmra.mxu0 %vm352_vm9, %v279_v59 }
 0x161   :  { %v686_v17 = vpop.f32.mrf.mxu1 }
 0x162   :  { %v443_v18 = vadd.f32 %v686_v17, %v339_v10 }
 0x163   :  { %v683_v19 = vpop.f32.mrf.mxu0  ;;  %v437_v20 = vpop.f32.mrf.mxu1 }
 0x164   :  { %v507_v22 = vrot.slane %v443_v18, %v843_v5  ;;  %v433_v23 = vadd.f32 %v683_v19, %v330_v15  ;;  %v438_v24 = vadd.f32 %v437_v20, %v347_v16 }
 0x165   :  { %v427_v25 = vpop.f32.mrf.mxu0 }
 0x166   :  { %v508_v26 = vcombine.high %v507_v22, %v507_v22  ;;  %v467_v27 = vcombine.high %v433_v23, %v433_v23  ;;  %v474_v28 = vrot.slane %v433_v23, %v843_v5  ;;  %v484_v29 = vcombine.high %v438_v24, %v438_v24 }
 0x167   :  { %v491_v30 = vrot.slane %v438_v24, %v843_v5  ;;  %v428_v31 = vadd.f32 %v427_v25, %v321_v21  ;;  %v535_v34 = vmax.f32 %v507_v22, 0.0 }
 0x168   :  { %v481_v32 = vrot.slane %v467_v27, %v843_v5  ;;  %v482_v33 = vcombine.high %v474_v28, %v474_v28  ;;  %v498_v35 = vrot.slane %v484_v29, %v843_v5  ;;  %v536_v38 = vmax.f32 %v508_v26, 0.0 }
 0x169   :  { %v499_v36 = vcombine.high %v491_v30, %v491_v30  ;;  %v450_v37 = vcombine.high %v428_v31, %v428_v31  ;;  %v527_v39 = vmax.f32 %v474_v28, 0.0  ;;  %v457_v43 = vrot.slane %v428_v31, %v843_v5 }
 0x16a   :  { %v483_v14 = vcombine.high %v481_v32, %v481_v32  ;;  %v528_v8 = vmax.f32 %v482_v33, 0.0  ;;  %v500_v40 = vcombine.high %v498_v35, %v498_v35  ;;  %v533_v42 = vmax.f32 %v498_v35, 0.0 }
 0x16b   :  { %v532_v41 = vmax.f32 %v499_v36, 0.0  ;;  %v531_v46 = vmax.f32 %v491_v30, 0.0  ;;  %v464_v47 = vrot.slane %v450_v37, %v843_v5  ;;  %v529_v48 = vmax.f32 %v481_v32, 0.0 }
 0x16c   :  { %v530_v44 = vmax.f32 %v483_v14, 0.0  ;;  %v568_v45 = vcombine.low %v527_v39, %v528_v8  ;;  %v534_v49 = vmax.f32 %v500_v40, 0.0  ;;  %v465_v51 = vcombine.high %v457_v43, %v457_v43 }
 0x16d   :  { %v585_v50 = vcombine.low %v532_v41, %v533_v42  ;;  %v466_v53 = vcombine.high %v464_v47, %v464_v47  ;;  %v523_v56 = vmax.f32 %v457_v43, 0.0  ;;  %v525_v60 = vmax.f32 %v464_v47, 0.0 }
 0x16e   :  { %v584_v52 = vcombine.low %v530_v44, %v531_v46  ;;  %v575_v54 = vrot.slane %v568_v45, %v843_v5  ;;  %v601_v55 = vcombine.low %v534_v49, %v535_v34  ;;  %v524_v57 = vmax.f32 %v465_v51, 0.0 }
 0x16f   :  { %v599_v59 = vrot.slane %v585_v50, %v843_v5  ;;  %v526_v61 = vmax.f32 %v466_v53, 0.0  ;;  %v615_v62 = vrot.slane %v536_v38, %v843_v5  ;;  %v582_v63 = vrot.slane %v529_v48, %v843_v5 }
 0x170   :  { %v592_v58 = vrot.slane %v584_v52, %v843_v5  ;;  %v608_v0 = vrot.slane %v601_v55, %v843_v5  ;;  %v551_v1 = vcombine.low %v523_v56, %v524_v57 }
 0x171   :  { %v552_v2 = vcombine.low %v525_v60, %v526_v61  ;;  %v583_v3 = vcombine.low %v575_v54, %v582_v63 }
 0x172   :  { %v616_v4 = vcombine.low %v608_v0, %v615_v62  ;;  %v600_v6 = vcombine.low %v592_v58, %v599_v59  ;;  %v559_v7 = vrot.slane %v551_v1, %v843_v5 }
 0x173   :  { %v566_v10 = vrot.slane %v552_v2, %v843_v5  ;;  %v621_v13 = vsel %vm61_vm1, %v583_v3, -inf }
 0x174   :  { %v629_v11 = vsel %vm61_vm1, %v616_v4, -inf }
 0x175   :  { %v567_v12 = vcombine.low %v559_v7, %v566_v10  ;;  %v630_v9 = vmax.f32 %v600_v6, %v629_v11 }
 0x177   :  { %v622_v15 = vmax.f32 %v567_v12, %v621_v13  ;;  %v631_v16 = vrot.slane %v630_v9, 4 }
 0x179   :  { %v623_v17 = vrot.slane %v622_v15, 4  ;;  %v632_v18 = vmax.f32 %v630_v9, %v631_v16 }
 0x17b   :  { %v624_v19 = vmax.f32 %v622_v15, %v623_v17  ;;  %v633_v20 = vrot.slane %v632_v18, 2 }
 0x17d   :  { %v625_v21 = vrot.slane %v624_v19, 2  ;;  %v634_v22 = vmax.f32 %v632_v18, %v633_v20 }
 0x17f   :  { %v626_v23 = vmax.f32 %v624_v19, %v625_v21  ;;  %v635_v24 = vrot.slane %v634_v22, 1 }
 0x181   :  { %v627_v25 = vrot.slane %v626_v23, 1  ;;  %v636_v26 = vmax.f32 %v634_v22, %v635_v24 }
 0x183   :  { %v628_v5 = vmax.f32 %v626_v23, %v627_v25 }
 0x185   :  { %v640_v27 = vsel %vm639_vm10, %v636_v26, %v628_v5 }
 0x186   :  { %642 = vst [vmem:[#allocation2] sm:$0x3] %v640_v27 }
 0x187   :  { %714 = shalt.err (!%p711_p4)
}
 0x188   :  { %652 = dma.vmem_to_hbm [thread:$0]  %s650_s7, 32, %s910_s3, [#allocation3]  }
 0x189   :  { %723 = dma.done.wait [#allocation3], 32  }
 0x18a   :  { %724 = vsyncadd [#allocation3], 4294967264 }
 0x18b   :  { %656 = vsyncpa [#allocation3], 1 }

</bundles_post_ra>
